<compile_context>
chip_gen: v7x
topology: tpu7x:2x2x1
jax: 0.10.0
libtpu: 0.0.40
codegen_flags: <defaults>
</compile_context>

<pallas_src>
import jax
import jax.numpy as jnp
from jax.experimental import pallas as pl
from jax.experimental.pallas import tpu as pltpu

EPS = 1e-5
KH = KW = 3
PAD = 1
LANE = 128
SUB = 8


def _round_up(v, m):
    return ((v + m - 1) // m) * m


@jax.jit
def mymodel_forward(x_nchw, conv_w, conv_b, param, bn_gamma, bn_beta):
    """Forward pass matching the PyTorch module. Input/output are NCHW, f32."""
    n, cin, h, w = x_nchw.shape
    cout = conv_w.shape[0]
    assert cin <= SUB and cout <= SUB, "layout assumes Cin, Cout <= 8"

    hp, wp = h + 2 * PAD, w + 2 * PAD
    l_valid = n * hp * wp                       # flattened padded-pixel count
    m_real = n * h * w                          # real pixel count for BN stats
    n_taps = KH * KW
    max_off = (KH - 1) * wp + (KW - 1)
    l_out = _round_up(l_valid, LANE)            # lane-dense output width
    l_in = _round_up(l_out + max_off, LANE)     # input width incl. shift slack
    offsets = tuple(kh * wp + kw for kh in range(KH) for kw in range(KW))
    inv_m = 1.0 / m_real

    # ---- layout glue (≈1x read amplification, no im2col in HBM) ----
    xpad = jnp.pad(x_nchw.astype(jnp.float32),
                   ((0, 0), (0, 0), (PAD, PAD), (PAD, PAD)))        # (N,Cin,H+2,W+2)
    x_flat = jnp.transpose(xpad, (1, 0, 2, 3)).reshape(cin, l_valid)
    x_flat = jnp.pad(x_flat, ((0, SUB - cin), (0, l_in - l_valid)))  # (8, Lpad)

    # ---- fold param into weights; per-tap (8,8) blocks stacked along sublanes ----
    p_scalar = param.reshape(()).astype(jnp.float32)                 # conv(p*x)=p*conv(x)
    w9 = jnp.transpose(conv_w.astype(jnp.float32), (2, 3, 0, 1)) * p_scalar  # (KH,KW,Co,Ci)
    w9 = w9.reshape(n_taps, cout, cin)
    w_stack = jnp.pad(w9, ((0, 0), (0, SUB - cout), (0, SUB - cin))).reshape(n_taps * SUB, SUB)

    # per-channel columns (padded rows: gamma=0 -> padded channels stay exactly 0)
    b_col = jnp.pad(conv_b.astype(jnp.float32), (0, SUB - cout)).reshape(SUB, 1)
    g_col = jnp.pad(bn_gamma.astype(jnp.float32), (0, SUB - cout)).reshape(SUB, 1)
    bt_col = jnp.pad(bn_beta.astype(jnp.float32), (0, SUB - cout)).reshape(SUB, 1)

    # valid-column mask on the padded-stride grid (constant-folded by XLA)
    q = jnp.arange(l_out)
    r = q % (hp * wp)
    mask = ((q < l_valid) & (r // wp < h) & (r % wp < w)).astype(jnp.float32)
    mask = mask.reshape(1, l_out)

    def kernel(w_ref, x_ref, b_ref, g_ref, bt_ref, m_ref, o_ref):
        xf = x_ref[...]                                   # (8, Lpad) VMEM resident
        acc = None
        for t, off in enumerate(offsets):                 # 9 taps, unrolled
            xs = xf if off == 0 else pltpu.roll(xf, l_in - off, axis=1)
            xt = xs[:, :l_out]                            # lane-aligned slice
            wt = w_ref[pl.ds(t * SUB, SUB), :]            # (8, 8) static sublane slice
            d = jnp.dot(wt, xt, preferred_element_type=jnp.float32)
            acc = d if acc is None else acc + d
        y = jnp.maximum(acc + b_ref[...], 0.0) * m_ref[...]   # bias + ReLU, junk cols -> 0
        s = jnp.sum(y, axis=1, keepdims=True)                  # (8,1) per-channel sum
        sq = jnp.sum(y * y, axis=1, keepdims=True)              # (8,1) per-channel sumsq
        mean = s * inv_m
        var = jnp.maximum(sq * inv_m - mean * mean, 0.0)
        scale = g_ref[...] * jax.lax.rsqrt(var + EPS)            # EUP rsqrt; padded rows: 0
        shift = bt_ref[...] - mean * scale
        o_ref[...] = y * scale + shift                           # single lane-dense store

    out2d = pl.pallas_call(
        kernel,
        grid=(1,),
        in_specs=[
            pl.BlockSpec((n_taps * SUB, SUB), lambda i: (0, 0)),   # weights
            pl.BlockSpec((SUB, l_in), lambda i: (0, 0)),           # flattened padded input
            pl.BlockSpec((SUB, 1), lambda i: (0, 0)),              # conv bias
            pl.BlockSpec((SUB, 1), lambda i: (0, 0)),              # BN gamma
            pl.BlockSpec((SUB, 1), lambda i: (0, 0)),              # BN beta
            pl.BlockSpec((1, l_out), lambda i: (0, 0)),            # valid-column mask
        ],
        out_specs=pl.BlockSpec((SUB, l_out), lambda i: (0, 0)),
        out_shape=jax.ShapeDtypeStruct((SUB, l_out), jnp.float32),
        compiler_params=pltpu.CompilerParams(dimension_semantics=("arbitrary",)),
        cost_estimate=pl.CostEstimate(
            flops=2 * n_taps * SUB * SUB * l_out,
            transcendentals=SUB,
            bytes_accessed=4 * (n_taps * SUB * SUB + SUB * l_in + 3 * SUB
                                + l_out + SUB * l_out)),
    )(w_stack, x_flat, b_col, g_col, bt_col, mask)

    # ---- back to NCHW (tiny slice/reshape, pure layout) ----
    out = out2d[:cout, :l_valid].reshape(cout, n, hp, wp)[:, :, :h, :w]
    return jnp.transpose(out, (1, 0, 2, 3))


def _reference(x_nchw, conv_w, conv_b, param, bn_gamma, bn_beta):
    """Pure-JAX reference of the PyTorch forward (for verification)."""
    x = jnp.transpose(x_nchw, (0, 2, 3, 1)).astype(jnp.float32) * param[0]
    w_hwio = jnp.transpose(conv_w, (2, 3, 1, 0)).astype(jnp.float32)
    y = jax.lax.conv_general_dilated(
        x, w_hwio, window_strides=(1, 1), padding="SAME",
        dimension_numbers=("NHWC", "HWIO", "NHWC"))
    y = y + conv_b.reshape(1, 1, 1, -1)
    y = jnp.maximum(y, 0.0)
    mean = jnp.mean(y, axis=(0, 1, 2), keepdims=True)
    var = jnp.mean((y - mean) ** 2, axis=(0, 1, 2), keepdims=True)
    y = (y - mean) / jnp.sqrt(var + EPS)
    y = y * bn_gamma.reshape(1, 1, 1, -1) + bn_beta.reshape(1, 1, 1, -1)
    return jnp.transpose(y, (0, 3, 1, 2))


if __name__ == "__main__":
    key = jax.random.PRNGKey(0)
    k_x, k_w, k_b, k_p = jax.random.split(key, 4)

    # Small shapes consistent with the module (conv1 requires Cin=3).
    N, C_IN, H, W = 2, 3, 16, 16
    C_OUT = 6

    x = jax.random.normal(k_x, (N, C_IN, H, W), dtype=jnp.float32)
    conv_w = 0.1 * jax.random.normal(k_w, (C_OUT, C_IN, KH, KW), dtype=jnp.float32)
    conv_b = 0.1 * jax.random.normal(k_b, (C_OUT,), dtype=jnp.float32)
    param = jax.random.normal(k_p, (1,), dtype=jnp.float32)   # nn.Parameter(randn(1))
    bn_gamma = jnp.ones((C_OUT,), dtype=jnp.float32)          # BatchNorm2d default weight
    bn_beta = jnp.zeros((C_OUT,), dtype=jnp.float32)          # BatchNorm2d default bias

    out = mymodel_forward(x, conv_w, conv_b, param, bn_gamma, bn_beta)
    out = jax.block_until_ready(out)

    ref = jax.block_until_ready(_reference(x, conv_w, conv_b, param, bn_gamma, bn_beta))
    assert out.shape == (N, C_OUT, H, W), out.shape
    assert jnp.allclose(out, ref, rtol=1e-4, atol=1e-4), \
        float(jnp.max(jnp.abs(out - ref)))

    print("KERNEL_OK")
</pallas_src>

<mosaic_0001>
module attributes {stable_mosaic.version = 11 : i64} {
  func.func @kernel(%arg0: i32, %arg1: memref<72x8xf32, #tpu.memory_space<vmem>>, %arg2: memref<8x896xf32, #tpu.memory_space<vmem>>, %arg3: memref<8x1xf32, #tpu.memory_space<vmem>>, %arg4: memref<8x1xf32, #tpu.memory_space<vmem>>, %arg5: memref<8x1xf32, #tpu.memory_space<vmem>>, %arg6: memref<1x768xf32, #tpu.memory_space<vmem>>, %arg7: memref<8x768xf32, #tpu.memory_space<vmem>>) attributes {dimension_semantics = [#tpu.dimension_semantics<arbitrary>], iteration_bounds = array<i64: 1>, scalar_prefetch = 0 : i64, scratch_operands = 0 : i64, tpu.core_type = #tpu.core_type<tc>, window_params = [{pipeline_mode = #tpu.pipeline_mode<synchronous>, transform_indices = @transform_0, window_bounds = array<i64: 72, 8>}, {pipeline_mode = #tpu.pipeline_mode<synchronous>, transform_indices = @transform_1, window_bounds = array<i64: 8, 896>}, {pipeline_mode = #tpu.pipeline_mode<synchronous>, transform_indices = @transform_2, window_bounds = array<i64: 8, 1>}, {pipeline_mode = #tpu.pipeline_mode<synchronous>, transform_indices = @transform_3, window_bounds = array<i64: 8, 1>}, {pipeline_mode = #tpu.pipeline_mode<synchronous>, transform_indices = @transform_4, window_bounds = array<i64: 8, 1>}, {pipeline_mode = #tpu.pipeline_mode<synchronous>, transform_indices = @transform_5, window_bounds = array<i64: 1, 768>}, {pipeline_mode = #tpu.pipeline_mode<synchronous>, transform_indices = @transform_6, window_bounds = array<i64: 8, 768>}]} {
    %c0 = arith.constant 0 : index
    %c0_0 = arith.constant 0 : index
    %0 = vector.load %arg2[%c0, %c0_0] : memref<8x896xf32, #tpu.memory_space<vmem>>, vector<8x896xf32>
    %1 = vector.extract_strided_slice %0 {offsets = [0, 0], sizes = [8, 768], strides = [1, 1]} : vector<8x896xf32> to vector<8x768xf32>
    %c0_1 = arith.constant 0 : index
    %c0_2 = arith.constant 0 : index
    %2 = vector.load %arg1[%c0_1, %c0_2] : memref<72x8xf32, #tpu.memory_space<vmem>>, vector<8x8xf32>
    %cst = arith.constant dense<0.000000e+00> : vector<8x768xf32>
    %3 = tpu.matmul %2, %1, %cst {dimension_numbers = #tpu.dot_dimension_numbers<[1], [0], [0], [1], [0, 0, 1, 1], [], []>} : vector<8x8xf32>, vector<8x768xf32>, vector<8x768xf32> -> vector<8x768xf32>
    %c895_i32 = arith.constant 895 : i32
    %4 = tpu.dynamic_rotate %0 by %c895_i32 dim 1 : vector<8x896xf32>, i32 -> vector<8x896xf32>
    %5 = vector.extract_strided_slice %4 {offsets = [0, 0], sizes = [8, 768], strides = [1, 1]} : vector<8x896xf32> to vector<8x768xf32>
    %c8 = arith.constant 8 : index
    %c0_3 = arith.constant 0 : index
    %6 = vector.load %arg1[%c8, %c0_3] : memref<72x8xf32, #tpu.memory_space<vmem>>, vector<8x8xf32>
    %cst_4 = arith.constant dense<0.000000e+00> : vector<8x768xf32>
    %7 = tpu.matmul %6, %5, %cst_4 {dimension_numbers = #tpu.dot_dimension_numbers<[1], [0], [0], [1], [0, 0, 1, 1], [], []>} : vector<8x8xf32>, vector<8x768xf32>, vector<8x768xf32> -> vector<8x768xf32>
    %8 = arith.addf %3, %7 : vector<8x768xf32>
    %c894_i32 = arith.constant 894 : i32
    %9 = tpu.dynamic_rotate %0 by %c894_i32 dim 1 : vector<8x896xf32>, i32 -> vector<8x896xf32>
    %10 = vector.extract_strided_slice %9 {offsets = [0, 0], sizes = [8, 768], strides = [1, 1]} : vector<8x896xf32> to vector<8x768xf32>
    %c16 = arith.constant 16 : index
    %c0_5 = arith.constant 0 : index
    %11 = vector.load %arg1[%c16, %c0_5] : memref<72x8xf32, #tpu.memory_space<vmem>>, vector<8x8xf32>
    %cst_6 = arith.constant dense<0.000000e+00> : vector<8x768xf32>
    %12 = tpu.matmul %11, %10, %cst_6 {dimension_numbers = #tpu.dot_dimension_numbers<[1], [0], [0], [1], [0, 0, 1, 1], [], []>} : vector<8x8xf32>, vector<8x768xf32>, vector<8x768xf32> -> vector<8x768xf32>
    %13 = arith.addf %8, %12 : vector<8x768xf32>
    %c878_i32 = arith.constant 878 : i32
    %14 = tpu.dynamic_rotate %0 by %c878_i32 dim 1 : vector<8x896xf32>, i32 -> vector<8x896xf32>
    %15 = vector.extract_strided_slice %14 {offsets = [0, 0], sizes = [8, 768], strides = [1, 1]} : vector<8x896xf32> to vector<8x768xf32>
    %c24 = arith.constant 24 : index
    %c0_7 = arith.constant 0 : index
    %16 = vector.load %arg1[%c24, %c0_7] : memref<72x8xf32, #tpu.memory_space<vmem>>, vector<8x8xf32>
    %cst_8 = arith.constant dense<0.000000e+00> : vector<8x768xf32>
    %17 = tpu.matmul %16, %15, %cst_8 {dimension_numbers = #tpu.dot_dimension_numbers<[1], [0], [0], [1], [0, 0, 1, 1], [], []>} : vector<8x8xf32>, vector<8x768xf32>, vector<8x768xf32> -> vector<8x768xf32>
    %18 = arith.addf %13, %17 : vector<8x768xf32>
    %c877_i32 = arith.constant 877 : i32
    %19 = tpu.dynamic_rotate %0 by %c877_i32 dim 1 : vector<8x896xf32>, i32 -> vector<8x896xf32>
    %20 = vector.extract_strided_slice %19 {offsets = [0, 0], sizes = [8, 768], strides = [1, 1]} : vector<8x896xf32> to vector<8x768xf32>
    %c32 = arith.constant 32 : index
    %c0_9 = arith.constant 0 : index
    %21 = vector.load %arg1[%c32, %c0_9] : memref<72x8xf32, #tpu.memory_space<vmem>>, vector<8x8xf32>
    %cst_10 = arith.constant dense<0.000000e+00> : vector<8x768xf32>
    %22 = tpu.matmul %21, %20, %cst_10 {dimension_numbers = #tpu.dot_dimension_numbers<[1], [0], [0], [1], [0, 0, 1, 1], [], []>} : vector<8x8xf32>, vector<8x768xf32>, vector<8x768xf32> -> vector<8x768xf32>
    %23 = arith.addf %18, %22 : vector<8x768xf32>
    %c876_i32 = arith.constant 876 : i32
    %24 = tpu.dynamic_rotate %0 by %c876_i32 dim 1 : vector<8x896xf32>, i32 -> vector<8x896xf32>
    %25 = vector.extract_strided_slice %24 {offsets = [0, 0], sizes = [8, 768], strides = [1, 1]} : vector<8x896xf32> to vector<8x768xf32>
    %c40 = arith.constant 40 : index
    %c0_11 = arith.constant 0 : index
    %26 = vector.load %arg1[%c40, %c0_11] : memref<72x8xf32, #tpu.memory_space<vmem>>, vector<8x8xf32>
    %cst_12 = arith.constant dense<0.000000e+00> : vector<8x768xf32>
    %27 = tpu.matmul %26, %25, %cst_12 {dimension_numbers = #tpu.dot_dimension_numbers<[1], [0], [0], [1], [0, 0, 1, 1], [], []>} : vector<8x8xf32>, vector<8x768xf32>, vector<8x768xf32> -> vector<8x768xf32>
    %28 = arith.addf %23, %27 : vector<8x768xf32>
    %c860_i32 = arith.constant 860 : i32
    %29 = tpu.dynamic_rotate %0 by %c860_i32 dim 1 : vector<8x896xf32>, i32 -> vector<8x896xf32>
    %30 = vector.extract_strided_slice %29 {offsets = [0, 0], sizes = [8, 768], strides = [1, 1]} : vector<8x896xf32> to vector<8x768xf32>
    %c48 = arith.constant 48 : index
    %c0_13 = arith.constant 0 : index
    %31 = vector.load %arg1[%c48, %c0_13] : memref<72x8xf32, #tpu.memory_space<vmem>>, vector<8x8xf32>
    %cst_14 = arith.constant dense<0.000000e+00> : vector<8x768xf32>
    %32 = tpu.matmul %31, %30, %cst_14 {dimension_numbers = #tpu.dot_dimension_numbers<[1], [0], [0], [1], [0, 0, 1, 1], [], []>} : vector<8x8xf32>, vector<8x768xf32>, vector<8x768xf32> -> vector<8x768xf32>
    %33 = arith.addf %28, %32 : vector<8x768xf32>
    %c859_i32 = arith.constant 859 : i32
    %34 = tpu.dynamic_rotate %0 by %c859_i32 dim 1 : vector<8x896xf32>, i32 -> vector<8x896xf32>
    %35 = vector.extract_strided_slice %34 {offsets = [0, 0], sizes = [8, 768], strides = [1, 1]} : vector<8x896xf32> to vector<8x768xf32>
    %c56 = arith.constant 56 : index
    %c0_15 = arith.constant 0 : index
    %36 = vector.load %arg1[%c56, %c0_15] : memref<72x8xf32, #tpu.memory_space<vmem>>, vector<8x8xf32>
    %cst_16 = arith.constant dense<0.000000e+00> : vector<8x768xf32>
    %37 = tpu.matmul %36, %35, %cst_16 {dimension_numbers = #tpu.dot_dimension_numbers<[1], [0], [0], [1], [0, 0, 1, 1], [], []>} : vector<8x8xf32>, vector<8x768xf32>, vector<8x768xf32> -> vector<8x768xf32>
    %38 = arith.addf %33, %37 : vector<8x768xf32>
    %c858_i32 = arith.constant 858 : i32
    %39 = tpu.dynamic_rotate %0 by %c858_i32 dim 1 : vector<8x896xf32>, i32 -> vector<8x896xf32>
    %40 = vector.extract_strided_slice %39 {offsets = [0, 0], sizes = [8, 768], strides = [1, 1]} : vector<8x896xf32> to vector<8x768xf32>
    %c64 = arith.constant 64 : index
    %c0_17 = arith.constant 0 : index
    %41 = vector.load %arg1[%c64, %c0_17] : memref<72x8xf32, #tpu.memory_space<vmem>>, vector<8x8xf32>
    %cst_18 = arith.constant dense<0.000000e+00> : vector<8x768xf32>
    %42 = tpu.matmul %41, %40, %cst_18 {dimension_numbers = #tpu.dot_dimension_numbers<[1], [0], [0], [1], [0, 0, 1, 1], [], []>} : vector<8x8xf32>, vector<8x768xf32>, vector<8x768xf32> -> vector<8x768xf32>
    %43 = arith.addf %38, %42 : vector<8x768xf32>
    %c0_19 = arith.constant 0 : index
    %c0_20 = arith.constant 0 : index
    %44 = vector.load %arg3[%c0_19, %c0_20] : memref<8x1xf32, #tpu.memory_space<vmem>>, vector<8x1xf32>
    %45 = vector.broadcast %44 : vector<8x1xf32> to vector<8x768xf32>
    %46 = arith.addf %43, %45 : vector<8x768xf32>
    %cst_21 = arith.constant 0.000000e+00 : f32
    %47 = vector.broadcast %cst_21 : f32 to vector<8x768xf32>
    %48 = arith.maximumf %46, %47 : vector<8x768xf32>
    %c0_22 = arith.constant 0 : index
    %c0_23 = arith.constant 0 : index
    %49 = vector.load %arg6[%c0_22, %c0_23] : memref<1x768xf32, #tpu.memory_space<vmem>>, vector<1x768xf32>
    %50 = vector.broadcast %49 : vector<1x768xf32> to vector<8x768xf32>
    %51 = arith.mulf %48, %50 : vector<8x768xf32>
    %cst_24 = arith.constant dense<0.000000e+00> : vector<8xf32>
    %52 = vector.multi_reduction <add>, %51, %cst_24 [1] : vector<8x768xf32> to vector<8xf32>
    %53 = vector.shape_cast %52 : vector<8xf32> to vector<8x1xf32>
    %54 = arith.mulf %51, %51 : vector<8x768xf32>
    %cst_25 = arith.constant dense<0.000000e+00> : vector<8xf32>
    %55 = vector.multi_reduction <add>, %54, %cst_25 [1] : vector<8x768xf32> to vector<8xf32>
    %56 = vector.shape_cast %55 : vector<8xf32> to vector<8x1xf32>
    %cst_26 = arith.constant 0.001953125 : f32
    %57 = vector.broadcast %cst_26 : f32 to vector<8x1xf32>
    %58 = arith.mulf %53, %57 : vector<8x1xf32>
    %cst_27 = arith.constant 0.001953125 : f32
    %59 = vector.broadcast %cst_27 : f32 to vector<8x1xf32>
    %60 = arith.mulf %56, %59 : vector<8x1xf32>
    %61 = arith.mulf %58, %58 : vector<8x1xf32>
    %62 = arith.subf %60, %61 : vector<8x1xf32>
    %cst_28 = arith.constant 0.000000e+00 : f32
    %63 = vector.broadcast %cst_28 : f32 to vector<8x1xf32>
    %64 = arith.maximumf %62, %63 : vector<8x1xf32>
    %c0_29 = arith.constant 0 : index
    %c0_30 = arith.constant 0 : index
    %65 = vector.load %arg4[%c0_29, %c0_30] : memref<8x1xf32, #tpu.memory_space<vmem>>, vector<8x1xf32>
    %cst_31 = arith.constant 9.99999974E-6 : f32
    %66 = vector.broadcast %cst_31 : f32 to vector<8x1xf32>
    %67 = arith.addf %64, %66 : vector<8x1xf32>
    %68 = math.rsqrt %67 : vector<8x1xf32>
    %69 = arith.mulf %65, %68 : vector<8x1xf32>
    %c0_32 = arith.constant 0 : index
    %c0_33 = arith.constant 0 : index
    %70 = vector.load %arg5[%c0_32, %c0_33] : memref<8x1xf32, #tpu.memory_space<vmem>>, vector<8x1xf32>
    %71 = arith.mulf %58, %69 : vector<8x1xf32>
    %72 = arith.subf %70, %71 : vector<8x1xf32>
    %73 = vector.broadcast %69 : vector<8x1xf32> to vector<8x768xf32>
    %74 = arith.mulf %51, %73 : vector<8x768xf32>
    %75 = vector.broadcast %72 : vector<8x1xf32> to vector<8x768xf32>
    %76 = arith.addf %74, %75 : vector<8x768xf32>
    %c0_34 = arith.constant 0 : index
    %c0_35 = arith.constant 0 : index
    %77 = vector.load %arg7[%c0_34, %c0_35] : memref<8x768xf32, #tpu.memory_space<vmem>>, vector<8x768xf32>
    tpu.vector_store %arg7[%c0_34, %c0_35], %76 {strides = array<i32>} : memref<8x768xf32, #tpu.memory_space<vmem>>, vector<8x768xf32>,
    return
  }
  func.func @transform_0(%arg0: i32) -> (i32, i32) {
    %c0_i32 = arith.constant 0 : i32
    %c0_i32_0 = arith.constant 0 : i32
    %c0_i32_1 = arith.constant 0 : i32
    return %c0_i32, %c0_i32_0 : i32, i32
  }
  func.func @transform_1(%arg0: i32) -> (i32, i32) {
    %c0_i32 = arith.constant 0 : i32
    %c0_i32_0 = arith.constant 0 : i32
    %c0_i32_1 = arith.constant 0 : i32
    return %c0_i32, %c0_i32_0 : i32, i32
  }
  func.func @transform_2(%arg0: i32) -> (i32, i32) {
    %c0_i32 = arith.constant 0 : i32
    %c0_i32_0 = arith.constant 0 : i32
    %c0_i32_1 = arith.constant 0 : i32
    return %c0_i32, %c0_i32_0 : i32, i32
  }
  func.func @transform_3(%arg0: i32) -> (i32, i32) {
    %c0_i32 = arith.constant 0 : i32
    %c0_i32_0 = arith.constant 0 : i32
    %c0_i32_1 = arith.constant 0 : i32
    return %c0_i32, %c0_i32_0 : i32, i32
  }
  func.func @transform_4(%arg0: i32) -> (i32, i32) {
    %c0_i32 = arith.constant 0 : i32
    %c0_i32_0 = arith.constant 0 : i32
    %c0_i32_1 = arith.constant 0 : i32
    return %c0_i32, %c0_i32_0 : i32, i32
  }
  func.func @transform_5(%arg0: i32) -> (i32, i32) {
    %c0_i32 = arith.constant 0 : i32
    %c0_i32_0 = arith.constant 0 : i32
    %c0_i32_1 = arith.constant 0 : i32
    return %c0_i32, %c0_i32_0 : i32, i32
  }
  func.func @transform_6(%arg0: i32) -> (i32, i32) {
    %c0_i32 = arith.constant 0 : i32
    %c0_i32_0 = arith.constant 0 : i32
    %c0_i32_1 = arith.constant 0 : i32
    return %c0_i32, %c0_i32_0 : i32, i32
  }
}

</mosaic_0001>

<bundles_post_ra>
// kernel: mymodel_forward.1
= control target key start
LH: loop header
LB: loop body
LE: loop exit
PB: predicated region body
PF: predicated region fallthrough
CT: control target
= control target key end

     0   :  { %v2405_v2 = vmov 0.0   ;;  %s2406_s25 = smov 127   ;;  %s2407_s12 = smov 126   ;;  %v2414_v8 = vmov 0   ;;  %v45_v9 = vlaneseq  ;;  %vm55_vm1 = vcmask 64512   ;;  %s2756_s1 = inlined_call_operand.vmem [shape: f32[8,896], index: 1, kind: input, shape index: {}]   ;;  %s2757_s2 = inlined_call_operand.vmem [shape: f32[8,1], index: 2, kind: input, shape index: {}]   ;;  %s2758_s0 = inlined_call_operand.vmem [shape: f32[72,8], index: 0, kind: input, shape index: {}]   ;;  %s2759_s5 = inlined_call_operand.vmem [shape: f32[1,768], index: 5, kind: input, shape index: {}]   ;;  %s2760_s3 = inlined_call_operand.vmem [shape: f32[8,1], index: 3, kind: input, shape index: {}]   ;;  %s2761_s4 = inlined_call_operand.vmem [shape: f32[8,1], index: 4, kind: input, shape index: {}]   ;;  %s2762_s6 = inlined_call_operand.vmem [shape: f32[8,768], index: 6, kind: output, shape index: {}]  }
   0x1   :  { %v2453_v0 = vld [vmem:[%s2756_s1 + $0x8] sm:$0xff]  ;;  %v2458_v1 = vld [vmem:[%s2756_s1] sm:$0xff]  ;;  %123 = vmatprep.mubr.f32.mxu1 %v2405_v2  ;;  %577 = vmatprep.mubr.f32.mxu0 %v2405_v2  ;;  %v2467_v3 = vld [vmem:[%s2756_s1 + $0x10] sm:$0xff]  ;;  %s2408_s13 = smov 110   ;;  %s2410_s14 = smov 108  }
   0x2   :  { %33 = vrot.lane.b32.xlu0 %v2453_v0, %s2406_s25  ;;  %31 = vrot.lane.b32.xlu1 %v2458_v1, %s2406_s25  ;;  %v2472_v4 = vld [vmem:[%s2756_s1 + $0x18] sm:$0xff]  ;;  %v2479_v5 = vld [vmem:[%s2756_s1 + $0x20] sm:$0xff]  ;;  %s2411_s15 = smov 92   ;;  %s2412_s16 = smov 91   ;;  %v2537_v11 = vand.u32 127, %v45_v9 }
   0x3   :  { %v2484_v6 = vld [vmem:[%s2756_s1 + $0x28] sm:$0xff]  ;;  %v29_v7 = vld [vmem:[%s2756_s1 + $0x30] sm:$0xff]  ;;  %s2409_s1 = smov 109   ;;  %s2413_s17 = smov 90   ;;  %2401 = vset.pattern.permute.xlu0 %v2414_v8  ;;  %2402 = vset.pattern.permute.xlu1 %v2414_v8  ;;  %v2196_v10 = vld [vmem:[%s2757_s2] sm:$0xff] }
   0x4   :  { %vm47_vm0 = vcmp.lt.s32.totalorder %v2537_v11, 127  ;;  %v54_v17 = vld [vmem:[%s2758_s0 + $0x8] sm:$0xff]  ;;  %vm502_vm2 = vcmp.lt.s32.totalorder %v2537_v11, 126  ;;  %v30_v31 = vld [vmem:[%s2758_s0] sm:$0xff]  ;;  %v509_v32 = vld [vmem:[%s2758_s0 + $0x10] sm:$0xff]  ;;  %vm746_vm3 = vcmp.lt.s32.totalorder %v2537_v11, 110 }
   0x5   :  { %v753_v46 = vld [vmem:[%s2758_s0 + $0x18] sm:$0xff]  ;;  %vm990_vm4 = vcmp.lt.s32.totalorder %v2537_v11, 109  ;;  %v997_v60 = vld [vmem:[%s2758_s0 + $0x20] sm:$0xff]  ;;  %vm1234_vm5 = vcmp.lt.s32.totalorder %v2537_v11, 108  ;;  %vm1478_vm6 = vcmp.lt.s32.totalorder %v2537_v11, 92  ;;  %vm1722_vm7 = vcmp.lt.s32.totalorder %v2537_v11, 91 }
   0x6   :  { %35 = vrot.lane.b32.xlu0 %v2467_v3, %s2406_s25  ;;  %37 = vrot.lane.b32.xlu1 %v2472_v4, %s2406_s25  ;;  %vm1966_vm8 = vcmp.lt.s32.totalorder %v2537_v11, 90 }
   0xa   :  { %39 = vrot.lane.b32.xlu0 %v2479_v5, %s2406_s25  ;;  %41 = vrot.lane.b32.xlu1 %v2484_v6, %s2406_s25 }
   0xe   :  { %43 = vrot.lane.b32.xlu0 %v29_v7, %s2406_s25  ;;  %490 = vrot.lane.b32.xlu1 %v2453_v0, %s2407_s12 }
  0x12   :  { %492 = vrot.lane.b32.xlu0 %v2467_v3, %s2407_s12  ;;  %488 = vrot.lane.b32.xlu1 %v2458_v1, %s2407_s12 }
  0x16   :  { %498 = vrot.lane.b32.xlu0 %v2484_v6, %s2407_s12  ;;  %500 = vrot.lane.b32.xlu1 %v29_v7, %s2407_s12 }
  0x1a   :  { %494 = vrot.lane.b32.xlu0 %v2472_v4, %s2407_s12  ;;  %496 = vrot.lane.b32.xlu1 %v2479_v5, %s2407_s12 }
  0x1e   :  { %734 = vrot.lane.b32.xlu0 %v2453_v0, %s2408_s13  ;;  %736 = vrot.lane.b32.xlu1 %v2467_v3, %s2408_s13 }
  0x22   :  { %732 = vrot.lane.b32.xlu0 %v2458_v1, %s2408_s13  ;;  %742 = vrot.lane.b32.xlu1 %v2484_v6, %s2408_s13 }
  0x26   :  { %744 = vrot.lane.b32.xlu0 %v29_v7, %s2408_s13  ;;  %738 = vrot.lane.b32.xlu1 %v2472_v4, %s2408_s13 }
  0x2a   :  { %740 = vrot.lane.b32.xlu0 %v2479_v5, %s2408_s13  ;;  %978 = vrot.lane.b32.xlu1 %v2453_v0, %s2409_s1 }
  0x2e   :  { %980 = vrot.lane.b32.xlu0 %v2467_v3, %s2409_s1  ;;  %976 = vrot.lane.b32.xlu1 %v2458_v1, %s2409_s1 }
  0x32   :  { %986 = vrot.lane.b32.xlu0 %v2484_v6, %s2409_s1  ;;  %988 = vrot.lane.b32.xlu1 %v29_v7, %s2409_s1 }
  0x36   :  { %982 = vrot.lane.b32.xlu0 %v2472_v4, %s2409_s1  ;;  %984 = vrot.lane.b32.xlu1 %v2479_v5, %s2409_s1 }
  0x3a   :  { %1222 = vrot.lane.b32.xlu0 %v2453_v0, %s2410_s14  ;;  %1224 = vrot.lane.b32.xlu1 %v2467_v3, %s2410_s14 }
  0x3e   :  { %1220 = vrot.lane.b32.xlu0 %v2458_v1, %s2410_s14  ;;  %1230 = vrot.lane.b32.xlu1 %v2484_v6, %s2410_s14 }
  0x42   :  { %1232 = vrot.lane.b32.xlu0 %v29_v7, %s2410_s14  ;;  %1226 = vrot.lane.b32.xlu1 %v2472_v4, %s2410_s14 }
  0x46   :  { %1228 = vrot.lane.b32.xlu0 %v2479_v5, %s2410_s14  ;;  %1466 = vrot.lane.b32.xlu1 %v2453_v0, %s2411_s15 }
  0x4a   :  { %1468 = vrot.lane.b32.xlu0 %v2467_v3, %s2411_s15  ;;  %1464 = vrot.lane.b32.xlu1 %v2458_v1, %s2411_s15 }
  0x4e   :  { %1474 = vrot.lane.b32.xlu0 %v2484_v6, %s2411_s15  ;;  %1476 = vrot.lane.b32.xlu1 %v29_v7, %s2411_s15 }
  0x52   :  { %1470 = vrot.lane.b32.xlu0 %v2472_v4, %s2411_s15  ;;  %1472 = vrot.lane.b32.xlu1 %v2479_v5, %s2411_s15 }
  0x56   :  { %1710 = vrot.lane.b32.xlu0 %v2453_v0, %s2412_s16  ;;  %1712 = vrot.lane.b32.xlu1 %v2467_v3, %s2412_s16 }
  0x5a   :  { %1708 = vrot.lane.b32.xlu0 %v2458_v1, %s2412_s16  ;;  %1718 = vrot.lane.b32.xlu1 %v2484_v6, %s2412_s16 }
  0x5e   :  { %1720 = vrot.lane.b32.xlu0 %v29_v7, %s2412_s16  ;;  %1714 = vrot.lane.b32.xlu1 %v2472_v4, %s2412_s16 }
  0x62   :  { %1716 = vrot.lane.b32.xlu0 %v2479_v5, %s2412_s16  ;;  %1954 = vrot.lane.b32.xlu1 %v2453_v0, %s2413_s17 }
  0x66   :  { %1956 = vrot.lane.b32.xlu0 %v2467_v3, %s2413_s17  ;;  %1952 = vrot.lane.b32.xlu1 %v2458_v1, %s2413_s17 }
  0x6a   :  { %1958 = vrot.lane.b32.xlu0 %v2472_v4, %s2413_s17  ;;  %1960 = vrot.lane.b32.xlu1 %v2479_v5, %s2413_s17 }
  0x6e   :  { %1962 = vrot.lane.b32.xlu0 %v2484_v6, %s2413_s17  ;;  %1964 = vrot.lane.b32.xlu1 %v29_v7, %s2413_s17 }
  0x72   :  { %2199 = vperm.xlu0 %2401, %v2196_v10  }
  0x74   :  { %v34_v12 = vpop.permute.xlu0 %33  ;;  %v32_v13 = vpop.permute.xlu1 %31 }
  0x75   :  { %v53_v18 = vsel %vm47_vm0, %v32_v13, %v34_v12  ;;  %v1241_v13 = vld [vmem:[%s2758_s0 + $0x28] sm:$0xff] }
  0x78   :  { %v36_v14 = vpop.permute.xlu0 %35  ;;  %v38_v15 = vpop.permute.xlu1 %37 }
  0x79   :  { %v52_v16 = vsel %vm47_vm0, %v34_v12, %v36_v14  ;;  %v51_v22 = vsel %vm47_vm0, %v36_v14, %v38_v15 }
  0x7a   :  { %59 = vmatprep.subr.mxu1 %v52_v16 }
  0x7b   :  { %60 = vmatpush1.msra.mxu1 %v53_v18 }
  0x7c   :  { %v40_v19 = vpop.permute.xlu0 %39  ;;  %v42_v20 = vpop.permute.xlu1 %41  ;;  %2316 = vmatmul.mubr.msk.f32.vlgmr.msra.gmra.mrb[0].mxu1 %vm55_vm1, %v54_v17 }
  0x7d   :  { %v50_v21 = vsel %vm47_vm0, %v38_v15, %v40_v19  ;;  %194 = vmatprep.mubr.f32.mxu1 %v2405_v2  ;;  %v49_v26 = vsel %vm47_vm0, %v40_v19, %v42_v20 }
  0x7e   :  { %130 = vmatprep.subr.mxu1 %v50_v21 }
  0x7f   :  { %131 = vmatpush1.msra.mxu1 %v51_v22 }
  0x80   :  { %v44_v23 = vpop.permute.xlu0 %43  ;;  %v491_v24 = vpop.permute.xlu1 %490  ;;  %2317 = vmatmul.mubr.msk.f32.vlgmr.msra.gmra.mrb[2].mxu1 %vm55_vm1, %v54_v17 }
  0x81   :  { %v48_v25 = vsel %vm47_vm0, %v42_v20, %v44_v23  ;;  %265 = vmatprep.mubr.f32.mxu1 %v2405_v2 }
  0x82   :  { %201 = vmatprep.subr.mxu1 %v48_v25 }
  0x83   :  { %202 = vmatpush1.msra.mxu1 %v49_v26 }
  0x84   :  { %v493_v27 = vpop.permute.xlu0 %492  ;;  %v489_v28 = vpop.permute.xlu1 %488  ;;  %2318 = vmatmul.mubr.msk.f32.vlgmr.msra.gmra.mrb[4].mxu1 %vm55_vm1, %v54_v17  ;;  %275 = vmatprep.subr.mxu1 %v2453_v0 }
  0x85   :  { %v507_v29 = vsel %vm502_vm2, %v491_v24, %v493_v27  ;;  %276 = vmatpush1.msra.mxu1 %v2458_v1  ;;  %339 = vmatprep.mubr.f32.mxu1 %v2405_v2  ;;  %v508_v30 = vsel %vm502_vm2, %v489_v28, %v491_v24 }
  0x86   :  { %513 = vmatprep.subr.mxu0 %v507_v29  ;;  %346 = vmatprep.subr.mxu1 %v2472_v4 }
  0x87   :  { %514 = vmatpush1.msra.mxu0 %v508_v30 }
  0x88   :  { %v499_v33 = vpop.permute.xlu0 %498  ;;  %v501_v34 = vpop.permute.xlu1 %500  ;;  %2319 = vmatmul.mubr.msk.f32.vlgmr.msra.gmra.mrb[0].mxu1 %vm55_vm1, %v30_v31  ;;  %2322 = vmatmul.mubr.msk.f32.vlgmr.msra.gmra.mrb[0].mxu0 %vm55_vm1, %v509_v32 }
  0x89   :  { %v503_v35 = vsel %vm502_vm2, %v499_v33, %v501_v34  ;;  %347 = vmatpush1.msra.mxu1 %v2467_v3  ;;  %410 = vmatprep.mubr.f32.mxu1 %v2405_v2 }
  0x8a   :  { %655 = vmatprep.subr.mxu0 %v503_v35  ;;  %417 = vmatprep.subr.mxu1 %v2484_v6 }
  0x8b   :  { %719 = vmatprep.mubr.f32.mxu0 %v2405_v2 }
  0x8c   :  { %v495_v36 = vpop.permute.xlu0 %494  ;;  %v497_v37 = vpop.permute.xlu1 %496  ;;  %2320 = vmatmul.mubr.msk.f32.vlgmr.msra.gmra.mrb[2].mxu1 %vm55_vm1, %v30_v31 }
  0x8d   :  { %v504_v38 = vsel %vm502_vm2, %v497_v37, %v499_v33  ;;  %418 = vmatpush1.msra.mxu1 %v2479_v5  ;;  %v505_v39 = vsel %vm502_vm2, %v495_v36, %v497_v37  ;;  %481 = vmatprep.mubr.f32.mxu1 %v2405_v2  ;;  %v506_v40 = vsel %vm502_vm2, %v493_v27, %v495_v36  ;;  %v1485_v27 = vld [vmem:[%s2758_s0 + $0x30] sm:$0xff] }
  0x8e   :  { %584 = vmatprep.subr.mxu1 %v505_v39  ;;  %656 = vmatpush1.msra.mxu0 %v504_v38 }
  0x8f   :  { %2324 = vmatmul.mubr.msk.f32.vlgmr.msra.gmra.mrb[2].mxu0 %vm55_vm1, %v509_v32 }
  0x90   :  { %v735_v41 = vpop.permute.xlu0 %734  ;;  %v737_v42 = vpop.permute.xlu1 %736  ;;  %2321 = vmatmul.mubr.msk.f32.vlgmr.msra.gmra.mrb[4].mxu1 %vm55_vm1, %v30_v31  ;;  %821 = vmatprep.mubr.f32.mxu0 %v2405_v2 }
  0x91   :  { %585 = vmatpush1.msra.mxu1 %v506_v40  ;;  %v751_v43 = vsel %vm746_vm3, %v735_v41, %v737_v42  ;;  %648 = vmatprep.mubr.f32.mxu1 %v2405_v2 }
  0x92   :  { %757 = vmatprep.subr.mxu0 %v751_v43 }
  0x94   :  { %v733_v44 = vpop.permute.xlu0 %732  ;;  %v743_v45 = vpop.permute.xlu1 %742  ;;  %2323 = vmatmul.mubr.msk.f32.vlgmr.msra.gmra.mrb[2].mxu1 %vm55_vm1, %v509_v32 }
  0x95   :  { %v752_v47 = vsel %vm746_vm3, %v733_v44, %v735_v41  ;;  %892 = vmatprep.mubr.f32.mxu1 %v2405_v2  ;;  %v1729_v41 = vld [vmem:[%s2758_s0 + $0x38] sm:$0xff] }
  0x96   :  { %758 = vmatpush1.msra.mxu0 %v752_v47 }
  0x97   :  { %2325 = vmatmul.mubr.msk.f32.vlgmr.msra.gmra.mrb[0].mxu0 %vm55_vm1, %v753_v46 }
  0x98   :  { %v745_v48 = vpop.permute.xlu0 %744  ;;  %v739_v49 = vpop.permute.xlu1 %738  ;;  %963 = vmatprep.mubr.f32.mxu0 %v2405_v2 }
  0x99   :  { %v747_v50 = vsel %vm746_vm3, %v743_v45, %v745_v48  ;;  %v750_v55 = vsel %vm746_vm3, %v737_v42, %v739_v49 }
  0x9a   :  { %899 = vmatprep.subr.mxu0 %v747_v50 }
  0x9c   :  { %v741_v51 = vpop.permute.xlu0 %740  ;;  %v979_v52 = vpop.permute.xlu1 %978 }
  0x9d   :  { %v748_v53 = vsel %vm746_vm3, %v741_v51, %v743_v45  ;;  %v749_v54 = vsel %vm746_vm3, %v739_v49, %v741_v51 }
  0x9e   :  { %828 = vmatprep.subr.mxu1 %v749_v54  ;;  %900 = vmatpush1.msra.mxu0 %v748_v53 }
  0x9f   :  { %829 = vmatpush1.msra.mxu1 %v750_v55  ;;  %2327 = vmatmul.mubr.msk.f32.vlgmr.msra.gmra.mrb[2].mxu0 %vm55_vm1, %v753_v46  ;;  %v1973_v55 = vld [vmem:[%s2758_s0 + $0x40] sm:$0xff] }
  0xa0   :  { %v981_v56 = vpop.permute.xlu0 %980  ;;  %v977_v57 = vpop.permute.xlu1 %976  ;;  %1065 = vmatprep.mubr.f32.mxu0 %v2405_v2  ;;  %2326 = vmatmul.mubr.msk.f32.vlgmr.msra.gmra.mrb[2].mxu1 %vm55_vm1, %v753_v46 }
  0xa1   :  { %v996_v58 = vsel %vm990_vm4, %v977_v57, %v979_v52  ;;  %v995_v59 = vsel %vm990_vm4, %v979_v52, %v981_v56  ;;  %1136 = vmatprep.mubr.f32.mxu1 %v2405_v2 }
  0xa2   :  { %1001 = vmatprep.subr.mxu0 %v995_v59 }
  0xa3   :  { %1002 = vmatpush1.msra.mxu0 %v996_v58 }
  0xa4   :  { %v987_v61 = vpop.permute.xlu0 %986  ;;  %v989_v62 = vpop.permute.xlu1 %988  ;;  %2328 = vmatmul.mubr.msk.f32.vlgmr.msra.gmra.mrb[0].mxu0 %vm55_vm1, %v997_v60 }
  0xa5   :  { %v991_v63 = vsel %vm990_vm4, %v987_v61, %v989_v62  ;;  %1207 = vmatprep.mubr.f32.mxu0 %v2405_v2 }
  0xa6   :  { %1143 = vmatprep.subr.mxu0 %v991_v63 }
  0xa8   :  { %v983_v0 = vpop.permute.xlu0 %982  ;;  %v985_v1 = vpop.permute.xlu1 %984 }
  0xa9   :  { %v994_v3 = vsel %vm990_vm4, %v981_v56, %v983_v0  ;;  %v992_v4 = vsel %vm990_vm4, %v985_v1, %v987_v61  ;;  %v993_v5 = vsel %vm990_vm4, %v983_v0, %v985_v1 }
  0xaa   :  { %1072 = vmatprep.subr.mxu1 %v993_v5  ;;  %1144 = vmatpush1.msra.mxu0 %v992_v4  ;;  %v2217_v4 = vshrl.u32 %v45_v9, 7 }
  0xab   :  { %1073 = vmatpush1.msra.mxu1 %v994_v3  ;;  %2330 = vmatmul.mubr.msk.f32.vlgmr.msra.gmra.mrb[2].mxu0 %vm55_vm1, %v997_v60 }
  0xac   :  { %v1223_v6 = vpop.permute.xlu0 %1222  ;;  %v1225_v7 = vpop.permute.xlu1 %1224  ;;  %1309 = vmatprep.mubr.f32.mxu0 %v2405_v2  ;;  %2329 = vmatmul.mubr.msk.f32.vlgmr.msra.gmra.mrb[2].mxu1 %vm55_vm1, %v997_v60  ;;  %v2218_v5 = vsub.s32 0, %v2217_v4 }
  0xad   :  { %v1239_v8 = vsel %vm1234_vm5, %v1223_v6, %v1225_v7  ;;  %1380 = vmatprep.mubr.f32.mxu1 %v2405_v2 }
  0xae   :  { %1245 = vmatprep.subr.mxu0 %v1239_v8  ;;  %v2214_v8 = vld [vmem:[%s2759_s5] sm:$0x3f] }
  0xb0   :  { %v1221_v10 = vpop.permute.xlu0 %1220  ;;  %v1231_v12 = vpop.permute.xlu1 %1230 }
  0xb1   :  { %v1240_v14 = vsel %vm1234_vm5, %v1221_v10, %v1223_v6  ;;  %v2222_v10 = vsub.s32 1, %v2217_v4 }
  0xb2   :  { %1246 = vmatpush1.msra.mxu0 %v1240_v14 }
  0xb3   :  { %2331 = vmatmul.mubr.msk.f32.vlgmr.msra.gmra.mrb[0].mxu0 %vm55_vm1, %v1241_v13 }
  0xb4   :  { %v1233_v15 = vpop.permute.xlu0 %1232  ;;  %v1227_v16 = vpop.permute.xlu1 %1226  ;;  %1451 = vmatprep.mubr.f32.mxu0 %v2405_v2 }
  0xb5   :  { %v1235_v17 = vsel %vm1234_vm5, %v1231_v12, %v1233_v15  ;;  %v1238_v22 = vsel %vm1234_vm5, %v1225_v7, %v1227_v16  ;;  %v2230_v15 = vsub.s32 3, %v2217_v4 }
  0xb6   :  { %1387 = vmatprep.subr.mxu0 %v1235_v17  ;;  %v2219_v17 = vrot.slane %v2214_v8, %v2218_v5 }
  0xb8   :  { %v1229_v18 = vpop.permute.xlu0 %1228  ;;  %v1467_v19 = vpop.permute.xlu1 %1466 }
  0xb9   :  { %v1236_v20 = vsel %vm1234_vm5, %v1229_v18, %v1231_v12  ;;  %v1237_v21 = vsel %vm1234_vm5, %v1227_v16, %v1229_v18 }
  0xba   :  { %1316 = vmatprep.subr.mxu1 %v1237_v21  ;;  %1388 = vmatpush1.msra.mxu0 %v1236_v20  ;;  %v2223_v20 = vrot.slane %v2214_v8, %v2222_v10 }
  0xbb   :  { %1317 = vmatpush1.msra.mxu1 %v1238_v22  ;;  %2333 = vmatmul.mubr.msk.f32.vlgmr.msra.gmra.mrb[2].mxu0 %vm55_vm1, %v1241_v13 }
  0xbc   :  { %v1469_v23 = vpop.permute.xlu0 %1468  ;;  %v1465_v24 = vpop.permute.xlu1 %1464  ;;  %1553 = vmatprep.mubr.f32.mxu0 %v2405_v2  ;;  %2332 = vmatmul.mubr.msk.f32.vlgmr.msra.gmra.mrb[2].mxu1 %vm55_vm1, %v1241_v13  ;;  %v2226_v13 = vsub.s32 2, %v2217_v4 }
  0xbd   :  { %v1484_v25 = vsel %vm1478_vm6, %v1465_v24, %v1467_v19  ;;  %v1483_v26 = vsel %vm1478_vm6, %v1467_v19, %v1469_v23  ;;  %1624 = vmatprep.mubr.f32.mxu1 %v2405_v2 }
  0xbe   :  { %1489 = vmatprep.subr.mxu0 %v1483_v26  ;;  %v2227_v22 = vrot.slane %v2214_v8, %v2226_v13  ;;  %v2231_v26 = vrot.slane %v2214_v8, %v2230_v15 }
  0xbf   :  { %1490 = vmatpush1.msra.mxu0 %v1484_v25 }
  0xc0   :  { %v1475_v28 = vpop.permute.xlu0 %1474  ;;  %v1477_v29 = vpop.permute.xlu1 %1476  ;;  %2334 = vmatmul.mubr.msk.f32.vlgmr.msra.gmra.mrb[0].mxu0 %vm55_vm1, %v1485_v27 }
  0xc1   :  { %v1479_v30 = vsel %vm1478_vm6, %v1475_v28, %v1477_v29  ;;  %1695 = vmatprep.mubr.f32.mxu0 %v2405_v2 }
  0xc2   :  { %1631 = vmatprep.subr.mxu0 %v1479_v30 }
  0xc4   :  { %v1471_v31 = vpop.permute.xlu0 %1470  ;;  %v1473_v32 = vpop.permute.xlu1 %1472 }
  0xc5   :  { %v1482_v33 = vsel %vm1478_vm6, %v1469_v23, %v1471_v31  ;;  %v1480_v34 = vsel %vm1478_vm6, %v1473_v32, %v1475_v28  ;;  %v1481_v35 = vsel %vm1478_vm6, %v1471_v31, %v1473_v32  ;;  %v2234_v28 = vsub.s32 4, %v2217_v4 }
  0xc6   :  { %1560 = vmatprep.subr.mxu1 %v1481_v35  ;;  %1632 = vmatpush1.msra.mxu0 %v1480_v34  ;;  %v2238_v32 = vsub.s32 5, %v2217_v4 }
  0xc7   :  { %1561 = vmatpush1.msra.mxu1 %v1482_v33  ;;  %2336 = vmatmul.mubr.msk.f32.vlgmr.msra.gmra.mrb[2].mxu0 %vm55_vm1, %v1485_v27 }
  0xc8   :  { %v1711_v36 = vpop.permute.xlu0 %1710  ;;  %v1713_v37 = vpop.permute.xlu1 %1712  ;;  %2335 = vmatmul.mubr.msk.f32.vlgmr.msra.gmra.mrb[2].mxu1 %vm55_vm1, %v1485_v27  ;;  %1797 = vmatprep.mubr.f32.mxu0 %v2405_v2 }
  0xc9   :  { %v1727_v38 = vsel %vm1722_vm7, %v1711_v36, %v1713_v37  ;;  %1868 = vmatprep.mubr.f32.mxu1 %v2405_v2 }
  0xca   :  { %1733 = vmatprep.subr.mxu0 %v1727_v38 }
  0xcc   :  { %v1709_v39 = vpop.permute.xlu0 %1708  ;;  %v1719_v40 = vpop.permute.xlu1 %1718 }
  0xcd   :  { %v1728_v42 = vsel %vm1722_vm7, %v1709_v39, %v1711_v36 }
  0xce   :  { %1734 = vmatpush1.msra.mxu0 %v1728_v42 }
  0xcf   :  { %2337 = vmatmul.mubr.msk.f32.vlgmr.msra.gmra.mrb[0].mxu0 %vm55_vm1, %v1729_v41 }
  0xd0   :  { %v1721_v43 = vpop.permute.xlu0 %1720  ;;  %v1715_v44 = vpop.permute.xlu1 %1714  ;;  %1939 = vmatprep.mubr.f32.mxu0 %v2405_v2 }
  0xd1   :  { %v1723_v45 = vsel %vm1722_vm7, %v1719_v40, %v1721_v43  ;;  %v1726_v50 = vsel %vm1722_vm7, %v1713_v37, %v1715_v44 }
  0xd2   :  { %1875 = vmatprep.subr.mxu0 %v1723_v45 }
  0xd4   :  { %v1717_v46 = vpop.permute.xlu0 %1716  ;;  %v1955_v47 = vpop.permute.xlu1 %1954 }
  0xd5   :  { %v1724_v48 = vsel %vm1722_vm7, %v1717_v46, %v1719_v40  ;;  %v1725_v49 = vsel %vm1722_vm7, %v1715_v44, %v1717_v46  ;;  %v2235_v44 = vrot.slane %v2214_v8, %v2234_v28  ;;  %v2239_v46 = vrot.slane %v2214_v8, %v2238_v32 }
  0xd6   :  { %1804 = vmatprep.subr.mxu1 %v1725_v49  ;;  %1876 = vmatpush1.msra.mxu0 %v1724_v48 }
  0xd7   :  { %1805 = vmatpush1.msra.mxu1 %v1726_v50  ;;  %2339 = vmatmul.mubr.msk.f32.vlgmr.msra.gmra.mrb[2].mxu0 %vm55_vm1, %v1729_v41 }
  0xd8   :  { %v1957_v51 = vpop.permute.xlu0 %1956  ;;  %v1953_v52 = vpop.permute.xlu1 %1952  ;;  %2338 = vmatmul.mubr.msk.f32.vlgmr.msra.gmra.mrb[2].mxu1 %vm55_vm1, %v1729_v41  ;;  %2041 = vmatprep.mubr.f32.mxu0 %v2405_v2 }
  0xd9   :  { %v1972_v53 = vsel %vm1966_vm8, %v1953_v52, %v1955_v47  ;;  %v1971_v54 = vsel %vm1966_vm8, %v1955_v47, %v1957_v51  ;;  %2112 = vmatprep.mubr.f32.mxu1 %v2405_v2 }
  0xda   :  { %1977 = vmatprep.subr.mxu0 %v1971_v54 }
  0xdb   :  { %1978 = vmatpush1.msra.mxu0 %v1972_v53 }
  0xdc   :  { %v1959_v56 = vpop.permute.xlu0 %1958  ;;  %v1961_v57 = vpop.permute.xlu1 %1960  ;;  %2340 = vmatmul.mubr.msk.f32.vlgmr.msra.gmra.mrb[0].mxu0 %vm55_vm1, %v1973_v55 }
  0xdd   :  { %v1970_v58 = vsel %vm1966_vm8, %v1957_v51, %v1959_v56  ;;  %v1969_v59 = vsel %vm1966_vm8, %v1959_v56, %v1961_v57  ;;  %2183 = vmatprep.mubr.f32.mxu0 %v2405_v2 }
  0xde   :  { %2048 = vmatprep.subr.mxu1 %v1969_v59 }
  0xdf   :  { %2049 = vmatpush1.msra.mxu1 %v1970_v58 }
  0xe0   :  { %v1963_v60 = vpop.permute.xlu0 %1962  ;;  %v1965_v61 = vpop.permute.xlu1 %1964  ;;  %2341 = vmatmul.mubr.msk.f32.vlgmr.msra.gmra.mrb[2].mxu1 %vm55_vm1, %v1973_v55 }
  0xe1   :  { %v1968_v62 = vsel %vm1966_vm8, %v1961_v57, %v1963_v60  ;;  %v1967_v63 = vsel %vm1966_vm8, %v1963_v60, %v1965_v61 }
  0xe2   :  { %2119 = vmatprep.subr.mxu0 %v1967_v63 }
  0xe3   :  { %2120 = vmatpush1.msra.mxu0 %v1968_v62 }
  0xe4   :  { %2342 = vmatmul.mubr.msk.f32.vlgmr.msra.gmra.mrb[2].mxu0 %vm55_vm1, %v1973_v55 }
  0xf1   :  { %v2200_v7 = vpop.permute.xlu0 %2199 }
 0x15b   :  { %v341_v0 = vpop.f32.mrb[0].mxu1 }
 0x15c   :  { %v343_v1 = vpop.f32.mrb[1].mxu1 }
 0x163   :  { %v483_v3 = vpop.f32.mrb[4].mxu1 }
 0x164   :  { %v485_v2 = vpop.f32.mrb[5].mxu1 }
 0x1af   :  { %v2043_v6 = vpop.f32.mrb[0].mxu0 }
 0x1b0   :  { %v2343_v11 = vadd.f32 %v2043_v6, %v341_v0  ;;  %v2045_v12 = vpop.f32.mrb[1].mxu0 }
 0x1b1   :  { %v2344_v14 = vadd.f32 %v2045_v12, %v343_v1 }
 0x1b2   :  { %v2202_v16 = vadd.f32 %v2343_v11, %v2200_v7  ;;  %v2281_v11 = vld [vmem:[%s2761_s4] sm:$0xff] }
 0x1b3   :  { %v2203_v18 = vadd.f32 %v2344_v14, %v2200_v7  ;;  %v2114_v19 = vpop.f32.mrb[2].mxu1 }
 0x1b4   :  { %v2208_v21 = vmax.f32 %v2202_v16, 0.0  ;;  %v2204_v9 = vadd.f32 %v2200_v7, %v2114_v19  ;;  %v2116_v23 = vpop.f32.mrb[3].mxu1 }
 0x1b5   :  { %v2209_v24 = vmax.f32 %v2203_v18, 0.0  ;;  %v2205_v25 = vadd.f32 %v2200_v7, %v2116_v23 }
 0x1b6   :  { %v2210_v27 = vmax.f32 %v2204_v9, 0.0  ;;  %v2246_v29 = vmul.f32 %v2219_v17, %v2208_v21 }
 0x1b7   :  { %v2211_v30 = vmax.f32 %v2205_v25, 0.0  ;;  %v2185_v31 = vpop.f32.mrb[2].mxu0  ;;  %v2247_v33 = vmul.f32 %v2223_v20, %v2209_v24 }
 0x1b8   :  { %v2248_v34 = vmul.f32 %v2227_v22, %v2210_v27  ;;  %v2345_v35 = vadd.f32 %v2185_v31, %v483_v3  ;;  %v2187_v36 = vpop.f32.mrb[3].mxu0  ;;  %v2259_v37 = vmul.f32 %v2246_v29, %v2246_v29 }
 0x1b9   :  { %v2249_v38 = vmul.f32 %v2231_v26, %v2211_v30  ;;  %v2346_v39 = vadd.f32 %v2187_v36, %v485_v2  ;;  %v2252_v40 = vadd.f32 %v2247_v33, %v2246_v29  ;;  %v2260_v41 = vmul.f32 %v2247_v33, %v2247_v33 }
 0x1ba   :  { %v2261_v42 = vmul.f32 %v2248_v34, %v2248_v34  ;;  %v2206_v43 = vadd.f32 %v2345_v35, %v2200_v7 }
 0x1bb   :  { %v2207_v45 = vadd.f32 %v2346_v39, %v2200_v7  ;;  %v2253_v47 = vadd.f32 %v2252_v40, %v2248_v34  ;;  %v2265_v48 = vadd.f32 %v2260_v41, %v2259_v37  ;;  %v2262_v52 = vmul.f32 %v2249_v38, %v2249_v38  ;;  %v2277_v7 = vld [vmem:[%s2760_s3] sm:$0xff] }
 0x1bc   :  { %v2212_v49 = vmax.f32 %v2206_v43, 0.0 }
 0x1bd   :  { %v2213_v50 = vmax.f32 %v2207_v45, 0.0  ;;  %v2254_v51 = vadd.f32 %v2253_v47, %v2249_v38  ;;  %v2266_v53 = vadd.f32 %v2265_v48, %v2261_v42 }
 0x1be   :  { %v2250_v54 = vmul.f32 %v2235_v44, %v2212_v49 }
 0x1bf   :  { %v2251_v55 = vmul.f32 %v2239_v46, %v2213_v50  ;;  %v2267_v56 = vadd.f32 %v2266_v53, %v2262_v52 }
 0x1c0   :  { %v2255_v57 = vadd.f32 %v2254_v51, %v2250_v54  ;;  %v2263_v58 = vmul.f32 %v2250_v54, %v2250_v54 }
 0x1c1   :  { %v2264_v59 = vmul.f32 %v2251_v55, %v2251_v55 }
 0x1c2   :  { %v2256_v60 = vadd.f32 %v2255_v57, %v2251_v55  ;;  %v2268_v61 = vadd.f32 %v2267_v56, %v2263_v58 }
 0x1c4   :  { %2257 = vadd.xlane.f32.xlu1 %v2256_v60  ;;  %v2269_v62 = vadd.f32 %v2268_v61, %v2264_v59 }
 0x1c6   :  { %2270 = vadd.xlane.f32.xlu0 %v2269_v62 }
 0x251   :  { %v2258_v63 = vpop.xlane.xlu1 %2257 }
 0x252   :  { %v2272_v0 = vmul.f32 0.001953125, %v2258_v63 }
 0x253   :  { %v2271_v1 = vpop.xlane.xlu0 %2270 }
 0x254   :  { %v2274_v3 = vmul.f32 %v2272_v0, %v2272_v0  ;;  %v2273_v2 = vmul.f32 0.001953125, %v2271_v1 }
 0x256   :  { %v2275_v4 = vsub.f32 %v2273_v2, %v2274_v3 }
 0x258   :  { %v2276_v5 = vmax.f32 %v2275_v4, 0.0 }
 0x25a   :  { %v2278_v6 = vadd.f32 1e-05, %v2276_v5 }
 0x25c   :  { %2403 = vrsqrt.f32 %v2278_v6 }
 0x266   :  { %v2404_v8 = vpop.eup %2403 }
 0x267   :  { %v2280_v10 = vmul.f32 %v2404_v8, %v2277_v7 }
 0x269   :  { %2286 = vperm.xlu1 %2402, %v2280_v10   ;;  %v2282_v12 = vmul.f32 %v2280_v10, %v2272_v0 }
 0x26b   :  { %v2283_v13 = vsub.f32 %v2281_v11, %v2282_v12 }
 0x26d   :  { %2297 = vperm.xlu0 %2401, %v2283_v13  }
 0x2e8   :  { %v2287_v14 = vpop.permute.xlu1 %2286 }
 0x2e9   :  { %v2289_v15 = vmul.f32 %v2287_v14, %v2246_v29  ;;  %v2290_v16 = vmul.f32 %v2287_v14, %v2247_v33  ;;  %v2291_v17 = vmul.f32 %v2287_v14, %v2248_v34  ;;  %v2292_v18 = vmul.f32 %v2287_v14, %v2249_v38 }
 0x2ea   :  { %v2293_v19 = vmul.f32 %v2287_v14, %v2250_v54  ;;  %v2294_v20 = vmul.f32 %v2287_v14, %v2251_v55 }
 0x2ec   :  { %v2298_v21 = vpop.permute.xlu0 %2297 }
 0x2ed   :  { %v2300_v9 = vadd.f32 %v2298_v21, %v2289_v15  ;;  %v2301_v22 = vadd.f32 %v2298_v21, %v2290_v16  ;;  %v2302_v23 = vadd.f32 %v2298_v21, %v2291_v17  ;;  %v2303_v24 = vadd.f32 %v2298_v21, %v2292_v18 }
 0x2ee   :  { %v2304_v25 = vadd.f32 %v2298_v21, %v2293_v19  ;;  %v2305_v26 = vadd.f32 %v2298_v21, %v2294_v20 }
 0x2ef   :  { %2306 = vst [vmem:[%s2762_s6] sm:$0xff] %v2300_v9  ;;  %2307 = vst [vmem:[%s2762_s6 + $0x8] sm:$0xff] %v2301_v22 }
 0x2f0   :  { %2308 = vst [vmem:[%s2762_s6 + $0x10] sm:$0xff] %v2302_v23  ;;  %2309 = vst [vmem:[%s2762_s6 + $0x18] sm:$0xff] %v2303_v24 }
 0x2f1   :  { %2310 = vst [vmem:[%s2762_s6 + $0x20] sm:$0xff] %v2304_v25  ;;  %2311 = vst [vmem:[%s2762_s6 + $0x28] sm:$0xff] %v2305_v26 }

</bundles_post_ra>
